<compile_context>
chip_gen: v7x
topology: tpu7x:2x2x1
jax: 0.10.0
libtpu: 0.0.40
codegen_flags: <defaults>
</compile_context>

<pallas_src>
import functools
import math

import jax
import jax.numpy as jnp
import numpy as np
from jax.experimental import pallas as pl
from jax.experimental.pallas import tpu as pltpu

EPS = 1e-12  # eps used by the tutorial-style custom LayerNorm


def _encoder_kernel(x_ref, wqkv_ref, wo_ref, w1_ref, w2_ref,
                    bqkv_ref, bf1_ref, vec_ref, o_ref, *, n_head, scale):
    f32 = jnp.float32
    bf16 = jnp.bfloat16

    x = x_ref[...]                                   # (S, D) f32, one sequence
    S, D = x.shape
    dk = D // n_head

    vec = vec_ref[...]                               # (6, D) f32
    bo = vec[0:1, :]
    g1 = vec[1:2, :]
    be1 = vec[2:3, :]
    bf2 = vec[3:4, :]
    g2 = vec[4:5, :]
    be2 = vec[5:6, :]

    # ---- fused QKV projection: one MXU matmul, bf16 in / f32 accumulation ----
    qkv = jnp.dot(x.astype(bf16), wqkv_ref[...],
                  preferred_element_type=f32) + bqkv_ref[...]        # (S, 3D)

    # ---- multi-head self-attention (per-head scores, fused output concat) ----
    ctx_parts = []
    for h in range(n_head):                          # static unroll over heads
        qh = (qkv[:, h * dk:(h + 1) * dk] * scale).astype(bf16)          # (S, dk)
        kh = qkv[:, D + h * dk:D + (h + 1) * dk].astype(bf16)            # (S, dk)
        vh = qkv[:, 2 * D + h * dk:2 * D + (h + 1) * dk].astype(bf16)    # (S, dk)
        s = jnp.einsum('qd,kd->qk', qh, kh,
                       preferred_element_type=f32)                       # (S, S)
        s = s - jnp.max(s, axis=-1, keepdims=True)
        e = jnp.exp(s)
        p = e * pl.reciprocal(jnp.sum(e, axis=-1, keepdims=True), approx=True)
        ctx_parts.append(jnp.dot(p.astype(bf16), vh,
                                 preferred_element_type=f32))            # (S, dk)
    ctx = jnp.concatenate(ctx_parts, axis=-1)                            # (S, D)

    # single K=D output projection (full-MXU contraction, no per-head matmuls)
    attn = jnp.dot(ctx.astype(bf16), wo_ref[...],
                   preferred_element_type=f32) + bo                      # (S, D)

    # drop1 -> identity (eval); residual + LayerNorm1 (f32 math)
    x1 = x + attn
    mu1 = jnp.mean(x1, axis=-1, keepdims=True)
    var1 = jnp.mean((x1 - mu1) ** 2, axis=-1, keepdims=True)
    x1n = (x1 - mu1) * jax.lax.rsqrt(var1 + EPS) * g1 + be1

    # ---- FeedForward: Linear -> ReLU -> Linear ----
    h1 = jnp.dot(x1n.astype(bf16), w1_ref[...],
                 preferred_element_type=f32) + bf1_ref[...]              # (S, H)
    h1 = jnp.maximum(h1, 0.0)
    ff = jnp.dot(h1.astype(bf16), w2_ref[...],
                 preferred_element_type=f32) + bf2                       # (S, D)

    # drop2 -> identity (eval); residual + LayerNorm2
    x2 = x1n + ff
    mu2 = jnp.mean(x2, axis=-1, keepdims=True)
    var2 = jnp.mean((x2 - mu2) ** 2, axis=-1, keepdims=True)
    o_ref[...] = (x2 - mu2) * jax.lax.rsqrt(var2 + EPS) * g2 + be2


def _vmem_limit_bytes(S, D, H, n_head):
    """Derive a per-call VMEM budget from the actual shapes (weights are
    resident; activations are per-sequence; x/out blocks are double-buffered)."""
    bf, f4 = 2, 4
    weights = (D * 3 * D + D * D + D * H + H * D) * bf \
        + (3 * D + H + 6 * D) * f4
    per_step = (S * D * f4) * 2 * 2          # x + out blocks, double-buffered
    per_step += S * 3 * D * f4               # qkv (f32)
    per_step += n_head * S * S * f4 * 2      # per-head scores + probs (margin)
    per_step += S * D * f4 * 6               # ctx/attn/x1/x1n/ff/x2
    per_step += S * H * f4 * 2               # FFN hidden
    limit = int((weights * 2 + per_step) * 1.5) + (8 << 20)
    return max(16 << 20, min(limit, 100 << 20))


def encoder_layer_pallas(x, params, n_head):
    """x: (B, S, D) float32. params: dict of fp32 arrays (see init_params)."""
    B, S, D = x.shape
    H = params["w1"].shape[1]
    assert D % n_head == 0, "d_model must be divisible by n_head"
    dk = D // n_head
    scale = 1.0 / math.sqrt(dk)
    bf16 = jnp.bfloat16

    # Wrapper-side parameter repacking (plain JAX, outside the kernel):
    #   * fuse Q/K/V weights into one (D, 3D) matmul operand (bf16 for the MXU)
    #   * stack the six (1, D) bias/gamma/beta vectors into one (6, D) operand
    wqkv = jnp.concatenate(
        [params["wq"], params["wk"], params["wv"]], axis=1).astype(bf16)  # (D,3D)
    bqkv = jnp.concatenate(
        [params["bq"], params["bk"], params["bv"]], axis=1)               # (1,3D) f32
    wo = params["wo"].astype(bf16)                                        # (D, D)
    w1 = params["w1"].astype(bf16)                                        # (D, H)
    w2 = params["w2"].astype(bf16)                                        # (H, D)
    vecs = jnp.concatenate(
        [params["bo"], params["g1"], params["be1"],
         params["bf2"], params["g2"], params["be2"]], axis=0)             # (6, D) f32

    kernel = functools.partial(_encoder_kernel, n_head=n_head, scale=scale)

    const = lambda b: (0, 0)   # weights: block index never changes -> resident
    out = pl.pallas_call(
        kernel,
        out_shape=jax.ShapeDtypeStruct((B, S, D), jnp.float32),
        grid=(B,),
        in_specs=[
            pl.BlockSpec((None, S, D), lambda b: (b, 0, 0)),   # x (per-sequence)
            pl.BlockSpec((D, 3 * D), const),                   # wqkv
            pl.BlockSpec((D, D), const),                       # wo
            pl.BlockSpec((D, H), const),                       # w1
            pl.BlockSpec((H, D), const),                       # w2
            pl.BlockSpec((1, 3 * D), const),                   # bqkv
            pl.BlockSpec((1, H), const),                       # bf1
            pl.BlockSpec((6, D), const),                       # packed vectors
        ],
        out_specs=pl.BlockSpec((None, S, D), lambda b: (b, 0, 0)),
        compiler_params=pltpu.CompilerParams(
            dimension_semantics=("parallel",),                 # megacore on v7x
            vmem_limit_bytes=_vmem_limit_bytes(S, D, H, n_head)),
    )(x, wqkv, wo, w1, w2, bqkv, params["bf1"], vecs)
    return out


# ---------------- plain-JAX f32 reference (module semantics) ----------------
def encoder_layer_ref(x, params, n_head):
    B, S, D = x.shape
    dk = D // n_head

    def ln(z, g, b):
        mu = jnp.mean(z, axis=-1, keepdims=True)
        var = jnp.mean((z - mu) ** 2, axis=-1, keepdims=True)
        return (z - mu) / jnp.sqrt(var + EPS) * g + b

    q = x @ params["wq"] + params["bq"]
    k = x @ params["wk"] + params["bk"]
    v = x @ params["wv"] + params["bv"]
    q = q.reshape(B, S, n_head, dk).transpose(0, 2, 1, 3)
    k = k.reshape(B, S, n_head, dk).transpose(0, 2, 1, 3)
    v = v.reshape(B, S, n_head, dk).transpose(0, 2, 1, 3)
    s = jnp.einsum("bhqd,bhkd->bhqk", q, k) / math.sqrt(dk)
    p = jax.nn.softmax(s, axis=-1)
    attn = jnp.einsum("bhqk,bhkd->bhqd", p, v).transpose(0, 2, 1, 3).reshape(B, S, D)
    attn = attn @ params["wo"] + params["bo"]
    x1 = ln(x + attn, params["g1"], params["be1"])
    ff = jnp.maximum(x1 @ params["w1"] + params["bf1"], 0.0) @ params["w2"] + params["bf2"]
    return ln(x1 + ff, params["g2"], params["be2"])


def init_params(key, d_model, hidden):
    keys = jax.random.split(key, 8)
    sd = 1.0 / math.sqrt(d_model)
    sh = 1.0 / math.sqrt(hidden)
    f32 = jnp.float32
    return {
        "wq": jax.random.normal(keys[0], (d_model, d_model), f32) * sd,
        "bq": jnp.zeros((1, d_model), f32),
        "wk": jax.random.normal(keys[1], (d_model, d_model), f32) * sd,
        "bk": jnp.zeros((1, d_model), f32),
        "wv": jax.random.normal(keys[2], (d_model, d_model), f32) * sd,
        "bv": jnp.zeros((1, d_model), f32),
        "wo": jax.random.normal(keys[3], (d_model, d_model), f32) * sd,
        "bo": jnp.zeros((1, d_model), f32),
        "g1": jnp.ones((1, d_model), f32),
        "be1": jnp.zeros((1, d_model), f32),
        "w1": jax.random.normal(keys[4], (d_model, hidden), f32) * sd,
        "bf1": jax.random.normal(keys[5], (1, hidden), f32) * 0.01,
        "w2": jax.random.normal(keys[6], (hidden, d_model), f32) * sh,
        "bf2": jax.random.normal(keys[7], (1, d_model), f32) * 0.01,
        "g2": jnp.ones((1, d_model), f32),
        "be2": jnp.zeros((1, d_model), f32),
    }


if __name__ == "__main__":
    B, S, D, H, N_HEAD = 2, 8, 32, 64, 4
    key = jax.random.PRNGKey(0)
    k_x, k_p = jax.random.split(key)
    x = jax.random.normal(k_x, (B, S, D), jnp.float32)
    params = init_params(k_p, D, H)

    out = encoder_layer_pallas(x, params, N_HEAD)
    out = jax.block_until_ready(out)

    ref = encoder_layer_ref(x, params, N_HEAD)
    out_np, ref_np = np.asarray(out), np.asarray(ref)
    # bf16 MXU operands + approx reciprocal => loosened elementwise tolerance,
    # plus a tight mean-error check to catch real semantic bugs.
    err = np.abs(out_np - ref_np)
    assert float(err.mean()) < 2e-2, f"mean abs err too high: {err.mean()}"
    np.testing.assert_allclose(out_np, ref_np, rtol=1e-1, atol=1e-1)
    print("KERNEL_OK")
</pallas_src>

<mosaic_0001>
module attributes {stable_mosaic.version = 11 : i64} {
  func.func @_encoder_kernel(%arg0: i32, %arg1: memref<1x8x32xf32, #tpu.memory_space<vmem>>, %arg2: memref<32x96xbf16, #tpu.memory_space<vmem>>, %arg3: memref<32x32xbf16, #tpu.memory_space<vmem>>, %arg4: memref<32x64xbf16, #tpu.memory_space<vmem>>, %arg5: memref<64x32xbf16, #tpu.memory_space<vmem>>, %arg6: memref<1x96xf32, #tpu.memory_space<vmem>>, %arg7: memref<1x64xf32, #tpu.memory_space<vmem>>, %arg8: memref<6x32xf32, #tpu.memory_space<vmem>>, %arg9: memref<1x8x32xf32, #tpu.memory_space<vmem>>) attributes {dimension_semantics = [#tpu.dimension_semantics<parallel>], iteration_bounds = array<i64: 2>, scalar_prefetch = 0 : i64, scratch_operands = 0 : i64, tpu.core_type = #tpu.core_type<tc>, window_params = [{transform_indices = @transform_0, window_bounds = array<i64: 1, 8, 32>}, {pipeline_mode = #tpu.pipeline_mode<synchronous>, transform_indices = @transform_1, window_bounds = array<i64: 32, 96>}, {pipeline_mode = #tpu.pipeline_mode<synchronous>, transform_indices = @transform_2, window_bounds = array<i64: 32, 32>}, {pipeline_mode = #tpu.pipeline_mode<synchronous>, transform_indices = @transform_3, window_bounds = array<i64: 32, 64>}, {pipeline_mode = #tpu.pipeline_mode<synchronous>, transform_indices = @transform_4, window_bounds = array<i64: 64, 32>}, {pipeline_mode = #tpu.pipeline_mode<synchronous>, transform_indices = @transform_5, window_bounds = array<i64: 1, 96>}, {pipeline_mode = #tpu.pipeline_mode<synchronous>, transform_indices = @transform_6, window_bounds = array<i64: 1, 64>}, {pipeline_mode = #tpu.pipeline_mode<synchronous>, transform_indices = @transform_7, window_bounds = array<i64: 6, 32>}, {transform_indices = @transform_8, window_bounds = array<i64: 1, 8, 32>}]} {
    %c0 = arith.constant 0 : index
    %c0_0 = arith.constant 0 : index
    %c0_1 = arith.constant 0 : index
    %0 = vector.load %arg1[%c0, %c0_0, %c0_1] : memref<1x8x32xf32, #tpu.memory_space<vmem>>, vector<1x8x32xf32>
    %1 = vector.shape_cast %0 : vector<1x8x32xf32> to vector<8x32xf32>
    %c0_2 = arith.constant 0 : index
    %c0_3 = arith.constant 0 : index
    %2 = vector.load %arg8[%c0_2, %c0_3] : memref<6x32xf32, #tpu.memory_space<vmem>>, vector<6x32xf32>
    %3 = vector.extract_strided_slice %2 {offsets = [0, 0], sizes = [1, 32], strides = [1, 1]} : vector<6x32xf32> to vector<1x32xf32>
    %4 = vector.extract_strided_slice %2 {offsets = [1, 0], sizes = [1, 32], strides = [1, 1]} : vector<6x32xf32> to vector<1x32xf32>
    %5 = vector.extract_strided_slice %2 {offsets = [2, 0], sizes = [1, 32], strides = [1, 1]} : vector<6x32xf32> to vector<1x32xf32>
    %6 = vector.extract_strided_slice %2 {offsets = [3, 0], sizes = [1, 32], strides = [1, 1]} : vector<6x32xf32> to vector<1x32xf32>
    %7 = vector.extract_strided_slice %2 {offsets = [4, 0], sizes = [1, 32], strides = [1, 1]} : vector<6x32xf32> to vector<1x32xf32>
    %8 = vector.extract_strided_slice %2 {offsets = [5, 0], sizes = [1, 32], strides = [1, 1]} : vector<6x32xf32> to vector<1x32xf32>
    %9 = arith.truncf %1 : vector<8x32xf32> to vector<8x32xbf16>
    %c0_4 = arith.constant 0 : index
    %c0_5 = arith.constant 0 : index
    %10 = vector.load %arg2[%c0_4, %c0_5] : memref<32x96xbf16, #tpu.memory_space<vmem>>, vector<32x96xbf16>
    %cst = arith.constant dense<0.000000e+00> : vector<8x96xf32>
    %11 = tpu.matmul %9, %10, %cst {dimension_numbers = #tpu.dot_dimension_numbers<[1], [0], [0], [1], [0, 0, 1, 1], [], []>} : vector<8x32xbf16>, vector<32x96xbf16>, vector<8x96xf32> -> vector<8x96xf32>
    %c0_6 = arith.constant 0 : index
    %c0_7 = arith.constant 0 : index
    %12 = vector.load %arg6[%c0_6, %c0_7] : memref<1x96xf32, #tpu.memory_space<vmem>>, vector<1x96xf32>
    %13 = vector.broadcast %12 : vector<1x96xf32> to vector<8x96xf32>
    %14 = arith.addf %11, %13 : vector<8x96xf32>
    %15 = vector.extract_strided_slice %14 {offsets = [0, 0], sizes = [8, 8], strides = [1, 1]} : vector<8x96xf32> to vector<8x8xf32>
    %cst_8 = arith.constant 0.353553385 : f32
    %16 = vector.broadcast %cst_8 : f32 to vector<8x8xf32>
    %17 = arith.mulf %15, %16 : vector<8x8xf32>
    %18 = arith.truncf %17 : vector<8x8xf32> to vector<8x8xbf16>
    %19 = vector.extract_strided_slice %14 {offsets = [0, 32], sizes = [8, 8], strides = [1, 1]} : vector<8x96xf32> to vector<8x8xf32>
    %20 = arith.truncf %19 : vector<8x8xf32> to vector<8x8xbf16>
    %21 = vector.extract_strided_slice %14 {offsets = [0, 64], sizes = [8, 8], strides = [1, 1]} : vector<8x96xf32> to vector<8x8xf32>
    %22 = arith.truncf %21 : vector<8x8xf32> to vector<8x8xbf16>
    "tpu.trace_start"() <{level = 10 : i32, message = "qd,kd->qk"}> : () -> ()
    %cst_9 = arith.constant dense<0.000000e+00> : vector<8x8xf32>
    %23 = tpu.matmul %18, %20, %cst_9 {dimension_numbers = #tpu.dot_dimension_numbers<[1], [1], [0], [0], [0, 0, 1, 0], [], []>} : vector<8x8xbf16>, vector<8x8xbf16>, vector<8x8xf32> -> vector<8x8xf32>
    "tpu.trace_stop"() : () -> ()
    %cst_10 = arith.constant dense<0xFF800000> : vector<8xf32>
    %24 = vector.multi_reduction <maximumf>, %23, %cst_10 [1] : vector<8x8xf32> to vector<8xf32>
    %25 = vector.shape_cast %24 : vector<8xf32> to vector<8x1xf32>
    %26 = vector.broadcast %25 : vector<8x1xf32> to vector<8x8xf32>
    %27 = arith.subf %23, %26 : vector<8x8xf32>
    %28 = math.exp %27 : vector<8x8xf32>
    %cst_11 = arith.constant dense<0.000000e+00> : vector<8xf32>
    %29 = vector.multi_reduction <add>, %28, %cst_11 [1] : vector<8x8xf32> to vector<8xf32>
    %30 = vector.shape_cast %29 : vector<8xf32> to vector<8x1xf32>
    %31 = tpu.reciprocal %30 {approx = true} : vector<8x1xf32> -> vector<8x1xf32>
    %32 = vector.broadcast %31 : vector<8x1xf32> to vector<8x8xf32>
    %33 = arith.mulf %28, %32 : vector<8x8xf32>
    %34 = arith.truncf %33 : vector<8x8xf32> to vector<8x8xbf16>
    %cst_12 = arith.constant dense<0.000000e+00> : vector<8x8xf32>
    %35 = tpu.matmul %34, %22, %cst_12 {dimension_numbers = #tpu.dot_dimension_numbers<[1], [0], [0], [1], [0, 0, 1, 1], [], []>} : vector<8x8xbf16>, vector<8x8xbf16>, vector<8x8xf32> -> vector<8x8xf32>
    %36 = vector.extract_strided_slice %14 {offsets = [0, 8], sizes = [8, 8], strides = [1, 1]} : vector<8x96xf32> to vector<8x8xf32>
    %cst_13 = arith.constant 0.353553385 : f32
    %37 = vector.broadcast %cst_13 : f32 to vector<8x8xf32>
    %38 = arith.mulf %36, %37 : vector<8x8xf32>
    %39 = arith.truncf %38 : vector<8x8xf32> to vector<8x8xbf16>
    %40 = vector.extract_strided_slice %14 {offsets = [0, 40], sizes = [8, 8], strides = [1, 1]} : vector<8x96xf32> to vector<8x8xf32>
    %41 = arith.truncf %40 : vector<8x8xf32> to vector<8x8xbf16>
    %42 = vector.extract_strided_slice %14 {offsets = [0, 72], sizes = [8, 8], strides = [1, 1]} : vector<8x96xf32> to vector<8x8xf32>
    %43 = arith.truncf %42 : vector<8x8xf32> to vector<8x8xbf16>
    "tpu.trace_start"() <{level = 10 : i32, message = "qd,kd->qk"}> : () -> ()
    %cst_14 = arith.constant dense<0.000000e+00> : vector<8x8xf32>
    %44 = tpu.matmul %39, %41, %cst_14 {dimension_numbers = #tpu.dot_dimension_numbers<[1], [1], [0], [0], [0, 0, 1, 0], [], []>} : vector<8x8xbf16>, vector<8x8xbf16>, vector<8x8xf32> -> vector<8x8xf32>
    "tpu.trace_stop"() : () -> ()
    %cst_15 = arith.constant dense<0xFF800000> : vector<8xf32>
    %45 = vector.multi_reduction <maximumf>, %44, %cst_15 [1] : vector<8x8xf32> to vector<8xf32>
    %46 = vector.shape_cast %45 : vector<8xf32> to vector<8x1xf32>
    %47 = vector.broadcast %46 : vector<8x1xf32> to vector<8x8xf32>
    %48 = arith.subf %44, %47 : vector<8x8xf32>
    %49 = math.exp %48 : vector<8x8xf32>
    %cst_16 = arith.constant dense<0.000000e+00> : vector<8xf32>
    %50 = vector.multi_reduction <add>, %49, %cst_16 [1] : vector<8x8xf32> to vector<8xf32>
    %51 = vector.shape_cast %50 : vector<8xf32> to vector<8x1xf32>
    %52 = tpu.reciprocal %51 {approx = true} : vector<8x1xf32> -> vector<8x1xf32>
    %53 = vector.broadcast %52 : vector<8x1xf32> to vector<8x8xf32>
    %54 = arith.mulf %49, %53 : vector<8x8xf32>
    %55 = arith.truncf %54 : vector<8x8xf32> to vector<8x8xbf16>
    %cst_17 = arith.constant dense<0.000000e+00> : vector<8x8xf32>
    %56 = tpu.matmul %55, %43, %cst_17 {dimension_numbers = #tpu.dot_dimension_numbers<[1], [0], [0], [1], [0, 0, 1, 1], [], []>} : vector<8x8xbf16>, vector<8x8xbf16>, vector<8x8xf32> -> vector<8x8xf32>
    %57 = vector.extract_strided_slice %14 {offsets = [0, 16], sizes = [8, 8], strides = [1, 1]} : vector<8x96xf32> to vector<8x8xf32>
    %cst_18 = arith.constant 0.353553385 : f32
    %58 = vector.broadcast %cst_18 : f32 to vector<8x8xf32>
    %59 = arith.mulf %57, %58 : vector<8x8xf32>
    %60 = arith.truncf %59 : vector<8x8xf32> to vector<8x8xbf16>
    %61 = vector.extract_strided_slice %14 {offsets = [0, 48], sizes = [8, 8], strides = [1, 1]} : vector<8x96xf32> to vector<8x8xf32>
    %62 = arith.truncf %61 : vector<8x8xf32> to vector<8x8xbf16>
    %63 = vector.extract_strided_slice %14 {offsets = [0, 80], sizes = [8, 8], strides = [1, 1]} : vector<8x96xf32> to vector<8x8xf32>
    %64 = arith.truncf %63 : vector<8x8xf32> to vector<8x8xbf16>
    "tpu.trace_start"() <{level = 10 : i32, message = "qd,kd->qk"}> : () -> ()
    %cst_19 = arith.constant dense<0.000000e+00> : vector<8x8xf32>
    %65 = tpu.matmul %60, %62, %cst_19 {dimension_numbers = #tpu.dot_dimension_numbers<[1], [1], [0], [0], [0, 0, 1, 0], [], []>} : vector<8x8xbf16>, vector<8x8xbf16>, vector<8x8xf32> -> vector<8x8xf32>
    "tpu.trace_stop"() : () -> ()
    %cst_20 = arith.constant dense<0xFF800000> : vector<8xf32>
    %66 = vector.multi_reduction <maximumf>, %65, %cst_20 [1] : vector<8x8xf32> to vector<8xf32>
    %67 = vector.shape_cast %66 : vector<8xf32> to vector<8x1xf32>
    %68 = vector.broadcast %67 : vector<8x1xf32> to vector<8x8xf32>
    %69 = arith.subf %65, %68 : vector<8x8xf32>
    %70 = math.exp %69 : vector<8x8xf32>
    %cst_21 = arith.constant dense<0.000000e+00> : vector<8xf32>
    %71 = vector.multi_reduction <add>, %70, %cst_21 [1] : vector<8x8xf32> to vector<8xf32>
    %72 = vector.shape_cast %71 : vector<8xf32> to vector<8x1xf32>
    %73 = tpu.reciprocal %72 {approx = true} : vector<8x1xf32> -> vector<8x1xf32>
    %74 = vector.broadcast %73 : vector<8x1xf32> to vector<8x8xf32>
    %75 = arith.mulf %70, %74 : vector<8x8xf32>
    %76 = arith.truncf %75 : vector<8x8xf32> to vector<8x8xbf16>
    %cst_22 = arith.constant dense<0.000000e+00> : vector<8x8xf32>
    %77 = tpu.matmul %76, %64, %cst_22 {dimension_numbers = #tpu.dot_dimension_numbers<[1], [0], [0], [1], [0, 0, 1, 1], [], []>} : vector<8x8xbf16>, vector<8x8xbf16>, vector<8x8xf32> -> vector<8x8xf32>
    %78 = vector.extract_strided_slice %14 {offsets = [0, 24], sizes = [8, 8], strides = [1, 1]} : vector<8x96xf32> to vector<8x8xf32>
    %cst_23 = arith.constant 0.353553385 : f32
    %79 = vector.broadcast %cst_23 : f32 to vector<8x8xf32>
    %80 = arith.mulf %78, %79 : vector<8x8xf32>
    %81 = arith.truncf %80 : vector<8x8xf32> to vector<8x8xbf16>
    %82 = vector.extract_strided_slice %14 {offsets = [0, 56], sizes = [8, 8], strides = [1, 1]} : vector<8x96xf32> to vector<8x8xf32>
    %83 = arith.truncf %82 : vector<8x8xf32> to vector<8x8xbf16>
    %84 = vector.extract_strided_slice %14 {offsets = [0, 88], sizes = [8, 8], strides = [1, 1]} : vector<8x96xf32> to vector<8x8xf32>
    %85 = arith.truncf %84 : vector<8x8xf32> to vector<8x8xbf16>
    "tpu.trace_start"() <{level = 10 : i32, message = "qd,kd->qk"}> : () -> ()
    %cst_24 = arith.constant dense<0.000000e+00> : vector<8x8xf32>
    %86 = tpu.matmul %81, %83, %cst_24 {dimension_numbers = #tpu.dot_dimension_numbers<[1], [1], [0], [0], [0, 0, 1, 0], [], []>} : vector<8x8xbf16>, vector<8x8xbf16>, vector<8x8xf32> -> vector<8x8xf32>
    "tpu.trace_stop"() : () -> ()
    %cst_25 = arith.constant dense<0xFF800000> : vector<8xf32>
    %87 = vector.multi_reduction <maximumf>, %86, %cst_25 [1] : vector<8x8xf32> to vector<8xf32>
    %88 = vector.shape_cast %87 : vector<8xf32> to vector<8x1xf32>
    %89 = vector.broadcast %88 : vector<8x1xf32> to vector<8x8xf32>
    %90 = arith.subf %86, %89 : vector<8x8xf32>
    %91 = math.exp %90 : vector<8x8xf32>
    %cst_26 = arith.constant dense<0.000000e+00> : vector<8xf32>
    %92 = vector.multi_reduction <add>, %91, %cst_26 [1] : vector<8x8xf32> to vector<8xf32>
    %93 = vector.shape_cast %92 : vector<8xf32> to vector<8x1xf32>
    %94 = tpu.reciprocal %93 {approx = true} : vector<8x1xf32> -> vector<8x1xf32>
    %95 = vector.broadcast %94 : vector<8x1xf32> to vector<8x8xf32>
    %96 = arith.mulf %91, %95 : vector<8x8xf32>
    %97 = arith.truncf %96 : vector<8x8xf32> to vector<8x8xbf16>
    %cst_27 = arith.constant dense<0.000000e+00> : vector<8x8xf32>
    %98 = tpu.matmul %97, %85, %cst_27 {dimension_numbers = #tpu.dot_dimension_numbers<[1], [0], [0], [1], [0, 0, 1, 1], [], []>} : vector<8x8xbf16>, vector<8x8xbf16>, vector<8x8xf32> -> vector<8x8xf32>
    %99 = tpu.concatenate %35, %56, %77, %98 in 1 : vector<8x8xf32>, vector<8x8xf32>, vector<8x8xf32>, vector<8x8xf32> -> vector<8x32xf32>
    %100 = arith.truncf %99 : vector<8x32xf32> to vector<8x32xbf16>
    %c0_28 = arith.constant 0 : index
    %c0_29 = arith.constant 0 : index
    %101 = vector.load %arg3[%c0_28, %c0_29] : memref<32x32xbf16, #tpu.memory_space<vmem>>, vector<32x32xbf16>
    %cst_30 = arith.constant dense<0.000000e+00> : vector<8x32xf32>
    %102 = tpu.matmul %100, %101, %cst_30 {dimension_numbers = #tpu.dot_dimension_numbers<[1], [0], [0], [1], [0, 0, 1, 1], [], []>} : vector<8x32xbf16>, vector<32x32xbf16>, vector<8x32xf32> -> vector<8x32xf32>
    %103 = vector.broadcast %3 : vector<1x32xf32> to vector<8x32xf32>
    %104 = arith.addf %102, %103 : vector<8x32xf32>
    %105 = arith.addf %1, %104 : vector<8x32xf32>
    %cst_31 = arith.constant dense<0.000000e+00> : vector<8xf32>
    %106 = vector.multi_reduction <add>, %105, %cst_31 [1] : vector<8x32xf32> to vector<8xf32>
    %107 = vector.shape_cast %106 : vector<8xf32> to vector<8x1xf32>
    %cst_32 = arith.constant 3.200000e+01 : f32
    %108 = vector.broadcast %cst_32 : f32 to vector<8x1xf32>
    %109 = arith.divf %107, %108 : vector<8x1xf32>
    %110 = vector.broadcast %109 : vector<8x1xf32> to vector<8x32xf32>
    %111 = arith.subf %105, %110 : vector<8x32xf32>
    %112 = arith.mulf %111, %111 : vector<8x32xf32>
    %cst_33 = arith.constant dense<0.000000e+00> : vector<8xf32>
    %113 = vector.multi_reduction <add>, %112, %cst_33 [1] : vector<8x32xf32> to vector<8xf32>
    %114 = vector.shape_cast %113 : vector<8xf32> to vector<8x1xf32>
    %cst_34 = arith.constant 3.200000e+01 : f32
    %115 = vector.broadcast %cst_34 : f32 to vector<8x1xf32>
    %116 = arith.divf %114, %115 : vector<8x1xf32>
    %117 = vector.broadcast %109 : vector<8x1xf32> to vector<8x32xf32>
    %118 = arith.subf %105, %117 : vector<8x32xf32>
    %cst_35 = arith.constant 9.99999996E-13 : f32
    %119 = vector.broadcast %cst_35 : f32 to vector<8x1xf32>
    %120 = arith.addf %116, %119 : vector<8x1xf32>
    %121 = math.rsqrt %120 : vector<8x1xf32>
    %122 = vector.broadcast %121 : vector<8x1xf32> to vector<8x32xf32>
    %123 = arith.mulf %118, %122 : vector<8x32xf32>
    %124 = vector.broadcast %4 : vector<1x32xf32> to vector<8x32xf32>
    %125 = arith.mulf %123, %124 : vector<8x32xf32>
    %126 = vector.broadcast %5 : vector<1x32xf32> to vector<8x32xf32>
    %127 = arith.addf %125, %126 : vector<8x32xf32>
    %128 = arith.truncf %127 : vector<8x32xf32> to vector<8x32xbf16>
    %c0_36 = arith.constant 0 : index
    %c0_37 = arith.constant 0 : index
    %129 = vector.load %arg4[%c0_36, %c0_37] : memref<32x64xbf16, #tpu.memory_space<vmem>>, vector<32x64xbf16>
    %cst_38 = arith.constant dense<0.000000e+00> : vector<8x64xf32>
    %130 = tpu.matmul %128, %129, %cst_38 {dimension_numbers = #tpu.dot_dimension_numbers<[1], [0], [0], [1], [0, 0, 1, 1], [], []>} : vector<8x32xbf16>, vector<32x64xbf16>, vector<8x64xf32> -> vector<8x64xf32>
    %c0_39 = arith.constant 0 : index
    %c0_40 = arith.constant 0 : index
    %131 = vector.load %arg7[%c0_39, %c0_40] : memref<1x64xf32, #tpu.memory_space<vmem>>, vector<1x64xf32>
    %132 = vector.broadcast %131 : vector<1x64xf32> to vector<8x64xf32>
    %133 = arith.addf %130, %132 : vector<8x64xf32>
    %cst_41 = arith.constant 0.000000e+00 : f32
    %134 = vector.broadcast %cst_41 : f32 to vector<8x64xf32>
    %135 = arith.maximumf %133, %134 : vector<8x64xf32>
    %136 = arith.truncf %135 : vector<8x64xf32> to vector<8x64xbf16>
    %c0_42 = arith.constant 0 : index
    %c0_43 = arith.constant 0 : index
    %137 = vector.load %arg5[%c0_42, %c0_43] : memref<64x32xbf16, #tpu.memory_space<vmem>>, vector<64x32xbf16>
    %cst_44 = arith.constant dense<0.000000e+00> : vector<8x32xf32>
    %138 = tpu.matmul %136, %137, %cst_44 {dimension_numbers = #tpu.dot_dimension_numbers<[1], [0], [0], [1], [0, 0, 1, 1], [], []>} : vector<8x64xbf16>, vector<64x32xbf16>, vector<8x32xf32> -> vector<8x32xf32>
    %139 = vector.broadcast %6 : vector<1x32xf32> to vector<8x32xf32>
    %140 = arith.addf %138, %139 : vector<8x32xf32>
    %141 = arith.addf %127, %140 : vector<8x32xf32>
    %cst_45 = arith.constant dense<0.000000e+00> : vector<8xf32>
    %142 = vector.multi_reduction <add>, %141, %cst_45 [1] : vector<8x32xf32> to vector<8xf32>
    %143 = vector.shape_cast %142 : vector<8xf32> to vector<8x1xf32>
    %cst_46 = arith.constant 3.200000e+01 : f32
    %144 = vector.broadcast %cst_46 : f32 to vector<8x1xf32>
    %145 = arith.divf %143, %144 : vector<8x1xf32>
    %146 = vector.broadcast %145 : vector<8x1xf32> to vector<8x32xf32>
    %147 = arith.subf %141, %146 : vector<8x32xf32>
    %148 = arith.mulf %147, %147 : vector<8x32xf32>
    %cst_47 = arith.constant dense<0.000000e+00> : vector<8xf32>
    %149 = vector.multi_reduction <add>, %148, %cst_47 [1] : vector<8x32xf32> to vector<8xf32>
    %150 = vector.shape_cast %149 : vector<8xf32> to vector<8x1xf32>
    %cst_48 = arith.constant 3.200000e+01 : f32
    %151 = vector.broadcast %cst_48 : f32 to vector<8x1xf32>
    %152 = arith.divf %150, %151 : vector<8x1xf32>
    %153 = vector.broadcast %145 : vector<8x1xf32> to vector<8x32xf32>
    %154 = arith.subf %141, %153 : vector<8x32xf32>
    %cst_49 = arith.constant 9.99999996E-13 : f32
    %155 = vector.broadcast %cst_49 : f32 to vector<8x1xf32>
    %156 = arith.addf %152, %155 : vector<8x1xf32>
    %157 = math.rsqrt %156 : vector<8x1xf32>
    %158 = vector.broadcast %157 : vector<8x1xf32> to vector<8x32xf32>
    %159 = arith.mulf %154, %158 : vector<8x32xf32>
    %160 = vector.broadcast %7 : vector<1x32xf32> to vector<8x32xf32>
    %161 = arith.mulf %159, %160 : vector<8x32xf32>
    %162 = vector.broadcast %8 : vector<1x32xf32> to vector<8x32xf32>
    %163 = arith.addf %161, %162 : vector<8x32xf32>
    %c0_50 = arith.constant 0 : index
    %c0_51 = arith.constant 0 : index
    %c0_52 = arith.constant 0 : index
    %164 = vector.load %arg9[%c0_50, %c0_51, %c0_52] : memref<1x8x32xf32, #tpu.memory_space<vmem>>, vector<1x8x32xf32>
    %165 = vector.shape_cast %164 : vector<1x8x32xf32> to vector<8x32xf32>
    %166 = vector.shape_cast %163 : vector<8x32xf32> to vector<1x8x32xf32>
    tpu.vector_store %arg9[%c0_50, %c0_51, %c0_52], %166 {strides = array<i32>} : memref<1x8x32xf32, #tpu.memory_space<vmem>>, vector<1x8x32xf32>,
    return
  }
  func.func @transform_0(%arg0: i32) -> (i32, i32, i32) {
    %c0_i32 = arith.constant 0 : i32
    %c0_i32_0 = arith.constant 0 : i32
    %c0_i32_1 = arith.constant 0 : i32
    return %arg0, %c0_i32, %c0_i32_0 : i32, i32, i32
  }
  func.func @transform_1(%arg0: i32) -> (i32, i32) {
    %c0_i32 = arith.constant 0 : i32
    %c0_i32_0 = arith.constant 0 : i32
    %c0_i32_1 = arith.constant 0 : i32
    return %c0_i32, %c0_i32_0 : i32, i32
  }
  func.func @transform_2(%arg0: i32) -> (i32, i32) {
    %c0_i32 = arith.constant 0 : i32
    %c0_i32_0 = arith.constant 0 : i32
    %c0_i32_1 = arith.constant 0 : i32
    return %c0_i32, %c0_i32_0 : i32, i32
  }
  func.func @transform_3(%arg0: i32) -> (i32, i32) {
    %c0_i32 = arith.constant 0 : i32
    %c0_i32_0 = arith.constant 0 : i32
    %c0_i32_1 = arith.constant 0 : i32
    return %c0_i32, %c0_i32_0 : i32, i32
  }
  func.func @transform_4(%arg0: i32) -> (i32, i32) {
    %c0_i32 = arith.constant 0 : i32
    %c0_i32_0 = arith.constant 0 : i32
    %c0_i32_1 = arith.constant 0 : i32
    return %c0_i32, %c0_i32_0 : i32, i32
  }
  func.func @transform_5(%arg0: i32) -> (i32, i32) {
    %c0_i32 = arith.constant 0 : i32
    %c0_i32_0 = arith.constant 0 : i32
    %c0_i32_1 = arith.constant 0 : i32
    return %c0_i32, %c0_i32_0 : i32, i32
  }
  func.func @transform_6(%arg0: i32) -> (i32, i32) {
    %c0_i32 = arith.constant 0 : i32
    %c0_i32_0 = arith.constant 0 : i32
    %c0_i32_1 = arith.constant 0 : i32
    return %c0_i32, %c0_i32_0 : i32, i32
  }
  func.func @transform_7(%arg0: i32) -> (i32, i32) {
    %c0_i32 = arith.constant 0 : i32
    %c0_i32_0 = arith.constant 0 : i32
    %c0_i32_1 = arith.constant 0 : i32
    return %c0_i32, %c0_i32_0 : i32, i32
  }
  func.func @transform_8(%arg0: i32) -> (i32, i32, i32) {
    %c0_i32 = arith.constant 0 : i32
    %c0_i32_0 = arith.constant 0 : i32
    %c0_i32_1 = arith.constant 0 : i32
    return %arg0, %c0_i32, %c0_i32_0 : i32, i32, i32
  }
}

</mosaic_0001>

<bundles_post_ra>
// kernel: tpu_custom_call.1
= control target key start
LH: loop header
LB: loop body
LE: loop exit
PB: predicated region body
PF: predicated region fallthrough
CT: control target
= control target key end

     0   :  { %13 = vsyncpa [#allocation3], 0  ;;  %s1880_s0 = inlined_call_operand.vmem [shape: f32[2,8,32], index: 0, kind: input, shape index: {}]   ;;  %s1881_s1 = inlined_call_operand.vmem [shape: bf16[32,96], index: 1, kind: input, shape index: {}]   ;;  %s1882_s2 = inlined_call_operand.vmem [shape: bf16[32,32], index: 2, kind: input, shape index: {}]   ;;  %s1883_s3 = inlined_call_operand.hbm [shape: bf16[32,64], index: 3, kind: input, shape index: {}]   ;;  %s1884_s4 = inlined_call_operand.vmem [shape: bf16[64,32], index: 4, kind: input, shape index: {}]   ;;  %s1885_s5 = inlined_call_operand.vmem [shape: f32[1,96], index: 5, kind: input, shape index: {}]   ;;  %s1886_s6 = inlined_call_operand.vmem [shape: f32[1,64], index: 6, kind: input, shape index: {}]   ;;  %s1887_s7 = inlined_call_operand.vmem [shape: f32[6,32], index: 7, kind: input, shape index: {}]   ;;  %s1888_s8 = inlined_call_operand.hbm [shape: f32[2,8,32], index: 8, kind: output, shape index: {}]  }
   0x1   :  { %14 = vsyncpa [#allocation4], 0 }
   0x2   :  { %16 = vsyncpa [#allocation4 + $0x1], 0  ;;  %s1606_s27 = smov 0   ;;  %s1608_s28 = smov 0  }
   0x3   :  { %s1610_s29 = smov 0   ;;  %s1612_s30 = smov 0  }
   0x4 LB: > { %s1627_s9 = sadd.s32 4294967295, %s1539_s30   ;;  %s1197_s10 = sadd.s32 4294967294, %s1539_s30   ;;  %s1539_s30 = sphi %s1612_s30, %s1904_s30   ;;  %s1535_s29 = sphi %s1610_s29, %s1903_s29   ;;  %s1531_s28 = sphi %s1608_s28, %s1902_s28   ;;  %s1527_s27 = sphi %s1606_s27, %s1901_s27  }
   0x5   : > { %s1631_s11 = sadd.s32 1, %s1539_s30   ;;  %s202_s12 = sadd.s32 1, %s1535_s29 }
   0x6   : > { %s199_s13 = ssub.s32 %s1539_s30, %s1631_s11  ;;  %p212_p0 = scmp.ne.s32.totalorder %s1535_s29, %s1531_s28 }
   0x7   : > { %p200_p1 = scmp.eq.s32.totalorder %s199_s13, 0  ;;  %p213_p2 = scmp.eq.s32.totalorder %s1627_s9, 1 }
   0x8   : > { %p218_p3 = scmp.ne.s32.totalorder %s1531_s28, %s1527_s27  ;;  %p219_p4 = scmp.eq.s32.totalorder %s1197_s10, 1 }
   0x9   : > { %s1642_s14 = scalar_select %p200_p1, %s1535_s29, %s202_s12  }
   0xa   : > { %p1644_p5 = por %p213_p2, %p212_p0  ;;  %p1648_p6 = por %p219_p4, %p218_p3 }
   0xb   : > { %p1198_p7 = scmp.ge.s32.totalorder %s1539_s30, 1  ;;  %p226_p8 = scmp.lt.s32.totalorder %s1539_s30, 3 }
   0xc   : > { %s1892_s15 = scalar_select %p1644_p5, 1, 0 }
   0xd   : > { %s1893_s16 = scalar_select %p1648_p6, 1, 0 }
   0xe   : > { %p1889_p9 = scmp.eq.s32.totalorder %s1627_s9, 0  ;;  %p1655_p10 = pnand %p1198_p7, %p226_p8 }
   0xf   : > { %s1541_s18 = smov [#allocation2]   ;;  %s1445_s23 = scalar_lea.hbm %s1883_s3, 256 }
  0x10   : > { %s1894_s17 = scalar_select %p1655_p10, 1, 0 }
  0x11   : > { %s244_s19 = sshll.u32 %s1541_s18, 4  ;;  %p1353_p11 = pneg %p1655_p10  ;;  %s245_s19 = int_to_ptr.vmem [resolvable:$true] %s244_s19 }
  0x12   : > { %p1446_p13 = scmp.ne.s32.totalorder %s1883_s3, %s1445_s23  ;;  %p1452_p3 = scmp.lt.u32.totalorder %s1445_s23, %s1883_s3 }
  0x13   : > { %p1663_p12 = pnand %p1889_p9, %p1353_p11 }
  0x15   : > { %p1447_p0 = pneg %p1663_p12 }
  0x17   : > { %p1448_p1 = pnand %p1447_p0, %p1446_p13 }
  0x19   : > { %p1449_p2 = pneg %p1448_p1 }
  0x1b   : > { %p1454_p4 = pnand %p1452_p3, %p1449_p2 }
  0x1d   : > { %1457 = shalt.err (!%p1454_p4)
}
  0x1e   : > { %s1458_s12 = scalar_lea.vmem %s245_s19, 256  ;;  %p1466_p9 = scmp.lt.s32.totalorder %s245_s19, %s245_s19 }
  0x1f   : > { %p1459_p7 = scmp.ne.s32.totalorder %s245_s19, %s1458_s12  ;;  %p1467_p6 = scmp.lt.s32.totalorder %s1458_s12, %s1458_s12 }
  0x21   : > { %p1461_p8 = pnand %p1459_p7, %p1447_p0  ;;  %p1468_p5 = por %p1467_p6, %p1466_p9 }
  0x23   : > { %p1462_p11 = pneg %p1461_p8 }
  0x25   : > { %p1469_p10 = pnand %p1468_p5, %p1462_p11 }
  0x27   : > { %1472 = shalt.err (!%p1469_p10)
}
  0x28   : > { %s1542_s13 = smov 64   ;;  %s1543_s18 = smov 4  }
  0x29   : > { %1356 = dma.hbm_to_vmem [thread:$0]  (!%p1663_p12), %s1883_s3, 256, %s245_s19, [#allocation3], %s1542_s13, %s1542_s13, %s1543_s18  }
  0x2a   : > { %p1896_p13 = scmp.ne.s32.totalorder %s1894_s17, 0 }
  0x2b   : > { %p1897_p1 = scmp.eq.s32.totalorder (!%p1896_p13), %s1627_s9, 0 }
  0x2c   : > { %279 = sbr.rel (%p1896_p13) target bundleno = 2613 (0xa35), region = 52 }
  0x33   : > { %1518 = dma.done.wait (%p1897_p1), [#allocation3], 256   ;;  %p1898_p0 = pmov %p1897_p1 }
  0x34   : > { %p312_p5 = scmp.lt.s32.totalorder %s1627_s9, 1  ;;  %v1544_v0 = vmov 0.0   ;;  %vm1545_vm0 = vmmov 0   ;;  %v1415_v1 = vld [vmem:[%s1881_s1] sm:$0xff]   ;;  %v1416_v2 = vld [vmem:[%s1881_s1 + $0x8] sm:$0xff]   ;;  %vm343_vm1 = vcmask 261120  }
  0x35   : > { %1520 = vsyncadd (%p1898_p0), [#allocation3], 4294967040  ;;  %1263 = vmatprep.subr.bf16.mxu0 %v1544_v0  ;;  %1267 = vmatprep.mubr.msk.bf16.mxu0 %vm1545_vm0, %v1544_v0  ;;  %v1205_v5 = vld [vmem:[%s1885_s5] ss:$0 sm:$0xff]  ;;  %s1546_s21 = smov 96   ;;  %s1547_s22 = smov 120  }
  0x36   : > { %s313_s19 = scalar_select %p312_p5, %s1627_s9, 1  ;;  %1271 = vmatprep.subr.bf16.mxu1 %v1544_v0  ;;  %1273 = vmatprep.mubr.msk.bf16.mxu1 %vm1545_vm0, %v1544_v0  ;;  %vm393_vm2 = vcmask 64512   ;;  %vm457_vm3 = vcmask 1043456   ;;  %vm845_vm4 = vcmask 130048   ;;  %vm847_vm5 = vcmask 195584  }
  0x37   : > { %1264 = vmatpush3.bf16.msra.mxu0 %v1415_v1  ;;  %s1550_s20 = smov 112   ;;  %s1551_s23 = smov 72   ;;  %vm1043_vm6 = vcmask 523264  }
  0x38   : > { %s1204_s17 = sshll.u32 %s313_s19, 3  ;;  %1265 = vmatprep.subr.bf16.mxu0 %v1544_v0  ;;  %s1548_s19 = smov 88  }
  0x39   : > { %s315_s24 = scalar_lea.vmem %s1880_s0, %s1204_s17  ;;  %s1549_s17 = smov 80  }
  0x3a   : > { %v1706_v3 = vld [vmem:[%s315_s24] sm:$0xff]  ;;  %s1552_s24 = smov 104   ;;  %s1553_s25 = smov 56  }
  0x3b   : > { %v319_v4 = vpack.c.bf16 %v1706_v3, %v1706_v3  ;;  %1266 = vmatpush3.bf16.msra.mxu0 %v1416_v2  ;;  %s1554_s26 = smov 64   ;;  %s1555_s10 = smov 40  }
  0x3c   : > { %1277 = vmatprep.subr.bf16.mxu0 %v1544_v0  ;;  %s1556_s12 = smov 48   ;;  %s1557_s13 = smov 8  }
  0x3d   : > { %p1899_p9 = scmp.ne.s32.totalorder %s1892_s15, 0 }
  0x3e   : > { %1268 = vmatmul.mubr.msk.bf16.vlgmr.msra.gmra.mrb[0].mxu0 %vm343_vm1, %v319_v4 }
  0x3f   : > { %1279 = vmatprep.mubr.msk.bf16.mxu0 %vm1545_vm0, %v1544_v0 }
 0x111   : > { %v381_v6 = vpop.f32.mrb[0].mxu0 }
 0x112   : > { %v382_v7 = vadd.f32 %v1205_v5, %v381_v6  ;;  %v1269_v8 = vpop.f32.mrb[1].mxu0 }
 0x113   : > { %v384_v9 = vpop.f32.mrb[2].mxu0 }
 0x114   : > { %v387_v10 = vmul.f32 0.35355338, %v382_v7  ;;  %v1718_v11 = vpack.c.bf16 %v382_v7, %v382_v7  ;;  %v1270_v12 = vpop.f32.mrb[3].mxu0 }
 0x116   : > { %v388_v13 = vpack.c.bf16 %v387_v10, %v387_v10  ;;  %391 = vrot.lane.b32.xlu0 %v1718_v11, %s1546_s21 }
 0x118   : > { %502 = vrot.lane.b32.xlu1 %v388_v13, %s1547_s22 }
 0x11a   : > { %504 = vrot.lane.b32.xlu0 %v1718_v11, %s1548_s19 }
 0x11c   : > { %614 = vrot.lane.b32.xlu1 %v1718_v11, %s1549_s17  ;;  %s1558_s17 = smov 16  }
 0x11e   : > { %612 = vrot.lane.b32.xlu0 %v388_v13, %s1550_s20  ;;  %s1559_s20 = smov 24  }
 0x120   : > { %724 = vrot.lane.b32.xlu1 %v1718_v11, %s1551_s23 }
 0x122   : > { %722 = vrot.lane.b32.xlu0 %v388_v13, %s1552_s24  ;;  %s1230_s24 = sshll.u32 %s1627_s9, 7  ;;  %s1560_s9 = smov [#allocation5]  }
 0x123   : > { %s1477_s22 = sshll.u32 %s1560_s9, 4  ;;  %s1478_s22 = int_to_ptr.vmem [resolvable:$false] %s1477_s22 }
 0x124   : > { %s1479_s19 = scalar_lea.vmem %s1478_s22, 256 }
 0x188   : > { %v392_v14 = vpop.permute.xlu0 %391 }
 0x189   : > { %v398_v15 = vsel %vm393_vm2, %v392_v14, 0 }
 0x18a   : > { %1272 = vmatpush3.bf16.xpose.msra.mxu1 %v398_v15  ;;  %v503_v17 = vpop.permute.xlu1 %502 }
 0x18b   : > { %1283 = vmatprep.subr.bf16.mxu1 %v1544_v0 }
 0x18c   : > { %v505_v16 = vpop.permute.xlu0 %504 }
 0x18d   : > { %v510_v18 = vsel %vm393_vm2, %v505_v16, 0 }
 0x18e   : > { %v615_v19 = vpop.permute.xlu1 %614 }
 0x18f   : > { %v620_v20 = vsel %vm393_vm2, %v615_v19, 0 }
 0x190   : > { %v613_v22 = vpop.permute.xlu0 %612 }
 0x191   : > { %1274 = vmatmul.mubr.msk.bf16.vlgmr.msra.gmra.mrb[0].mxu1 %vm393_vm2, %v388_v13 }
 0x192   : > { %1284 = vmatpush3.bf16.xpose.msra.mxu1 %v510_v18  ;;  %1285 = vmatprep.mubr.msk.bf16.mxu1 %vm1545_vm0, %v1544_v0  ;;  %v725_v21 = vpop.permute.xlu1 %724 }
 0x193   : > { %1295 = vmatprep.subr.bf16.mxu1 %v1544_v0  ;;  %v730_v23 = vsel %vm393_vm2, %v725_v21, 0 }
 0x194   : > { %v723_v24 = vpop.permute.xlu0 %722 }
 0x199   : > { %1286 = vmatmul.mubr.msk.bf16.vlgmr.msra.gmra.mrb[4].mxu1 %vm393_vm2, %v503_v17 }
 0x19a   : > { %1296 = vmatpush3.bf16.xpose.msra.mxu1 %v620_v20  ;;  %1297 = vmatprep.mubr.msk.bf16.mxu1 %vm1545_vm0, %v1544_v0 }
 0x19b   : > { %1307 = vmatprep.subr.bf16.mxu1 %v1544_v0 }
 0x1a1   : > { %1298 = vmatmul.mubr.msk.bf16.vlgmr.msra.gmra.mrb[8].mxu1 %vm393_vm2, %v613_v22 }
 0x1a2   : > { %1308 = vmatpush3.bf16.xpose.msra.mxu1 %v730_v23  ;;  %1309 = vmatprep.mubr.msk.bf16.mxu1 %vm1545_vm0, %v1544_v0 }
 0x1a3   : > { %1319 = vmatprep.subr.bf16.mxu1 %v1544_v0 }
 0x1a9   : > { %1310 = vmatmul.mubr.msk.bf16.vlgmr.msra.gmra.mrb[12].mxu1 %vm393_vm2, %v723_v24 }
 0x1aa   : > { %1323 = vmatprep.mubr.msk.bf16.mxu1 %vm1545_vm0, %v1544_v0 }
 0x264   : > { %v434_v25 = vpop.f32.mrb[0].mxu1 }
 0x265   : > { %v1275_v26 = vpop.f32.mrb[1].mxu1  ;;  %v440_v27 = vsel %vm393_vm2, %v434_v25, -inf }
 0x266   : > { %441 = vmax.xlane.f32.xlu1 %v440_v27  ;;  %v437_v28 = vpop.f32.mrb[2].mxu1 }
 0x267   : > { %v1276_v29 = vpop.f32.mrb[3].mxu1 }
 0x26c   : > { %v546_v30 = vpop.f32.mrb[4].mxu1 }
 0x26d   : > { %v1287_v31 = vpop.f32.mrb[5].mxu1  ;;  %v552_v32 = vsel %vm393_vm2, %v546_v30, -inf }
 0x26e   : > { %553 = vmax.xlane.f32.xlu0 %v552_v32  ;;  %v549_v33 = vpop.f32.mrb[6].mxu1 }
 0x26f   : > { %v1288_v34 = vpop.f32.mrb[7].mxu1 }
 0x274   : > { %v656_v35 = vpop.f32.mrb[8].mxu1 }
 0x275   : > { %v1299_v36 = vpop.f32.mrb[9].mxu1  ;;  %v662_v37 = vsel %vm393_vm2, %v656_v35, -inf }
 0x276   : > { %663 = vmax.xlane.f32.xlu0 %v662_v37  ;;  %v659_v38 = vpop.f32.mrb[10].mxu1  ;;  %v1418_v36 = vld [vmem:[%s1882_s2 + $0x8] sm:$0xff]  }
 0x277   : > { %v1300_v39 = vpop.f32.mrb[11].mxu1 }
 0x27c   : > { %v766_v40 = vpop.f32.mrb[12].mxu1 }
 0x27d   : > { %v1311_v41 = vpop.f32.mrb[13].mxu1  ;;  %v772_v42 = vsel %vm393_vm2, %v766_v40, -inf }
 0x27e   : > { %773 = vmax.xlane.f32.xlu1 %v772_v42  ;;  %v769_v43 = vpop.f32.mrb[14].mxu1 }
 0x27f   : > { %v1312_v44 = vpop.f32.mrb[15].mxu1 }
 0x2f3   : > { %v442_v45 = vpop.xlane.xlu1 %441 }
 0x2f4   : > { %v443_v46 = vsub.f32 %v434_v25, %v442_v45 }
 0x2f6   : > { %v444_v47 = vmul.f32 1.442695, %v443_v46 }
 0x2f8   : > { %1425 = vpow2.f32 %v444_v47 }
 0x2fb   : > { %v554_v48 = vpop.xlane.xlu0 %553 }
 0x2fc   : > { %v555_v49 = vsub.f32 %v546_v30, %v554_v48 }
 0x2fe   : > { %v556_v50 = vmul.f32 1.442695, %v555_v49 }
 0x300   : > { %1427 = vpow2.f32 %v556_v50 }
 0x302   : > { %v1426_v51 = vpop.eup %1425 }
 0x303   : > { %v664_v52 = vpop.xlane.xlu0 %663  ;;  %v446_v53 = vsel %vm393_vm2, %v1426_v51, 0.0 }
 0x304   : > { %v665_v54 = vsub.f32 %v656_v35, %v664_v52  ;;  %447 = vadd.xlane.f32.xlu0 %v446_v53  ;;  %v1417_v35 = vld [vmem:[%s1882_s2] sm:$0xff]   ;;  %v854_v52 = vlaneseq }
 0x305   : > { %1320 = vmatpush3.bf16.msra.mxu1 %v1417_v35 }
 0x306   : > { %v666_v55 = vmul.f32 1.442695, %v665_v54  ;;  %1321 = vmatprep.subr.bf16.mxu1 %v1544_v0  ;;  %v1788_v53 = vshrl.u32 %v854_v52, 7 }
 0x308   : > { %1429 = vpow2.f32 %v666_v55  ;;  %v856_v54 = vsub.s32 0, %v1788_v53  ;;  %v1794_v55 = vld [vmem:[%s1887_s7] sm:$0x3f] }
 0x309   : > { %1322 = vmatpush3.bf16.msra.mxu1 %v1418_v36 }
 0x30a   : > { %v1428_v56 = vpop.eup %1427  ;;  %1335 = vmatprep.subr.bf16.mxu1 %v1544_v0 }
 0x30b   : > { %v558_v57 = vsel %vm393_vm2, %v1428_v56, 0.0  ;;  %v774_v60 = vpop.xlane.xlu1 %773 }
 0x30c   : > { %559 = vadd.xlane.f32.xlu1 %v558_v57  ;;  %v775_v61 = vsub.f32 %v766_v40, %v774_v60 }
 0x30e   : > { %v776_v62 = vmul.f32 1.442695, %v775_v61 }
 0x310   : > { %1431 = vpow2.f32 %v776_v62 }
 0x312   : > { %v1430_v58 = vpop.eup %1429 }
 0x313   : > { %v668_v59 = vsel %vm393_vm2, %v1430_v58, 0.0 }
 0x314   : > { %669 = vadd.xlane.f32.xlu0 %v668_v59 }
 0x31a   : > { %v1432_v63 = vpop.eup %1431 }
 0x31b   : > { %v778_v1 = vsel %vm393_vm2, %v1432_v63, 0.0 }
 0x31d   : > { %564 = vrot.lane.b32.xlu1 %v1718_v11, %s1553_s25 }
 0x32a   : > { %452 = vrot.lane.b32.xlu0 %v1718_v11, %s1554_s26 }
 0x32e   : > { %784 = vrot.lane.b32.xlu0 %v1718_v11, %s1555_s10 }
 0x341   : > { %779 = vadd.xlane.f32.xlu1 %v778_v1 }
 0x352   : > { %674 = vrot.lane.b32.xlu1 %v1718_v11, %s1556_s12 }
 0x391   : > { %v448_v2 = vpop.xlane.xlu0 %447 }
 0x392   : > { %1433 = vrcp.f32 %v448_v2 }
 0x399   : > { %v560_v4 = vpop.xlane.xlu1 %559 }
 0x39a   : > { %1435 = vrcp.f32 %v560_v4 }
 0x39c   : > { %v1434_v5 = vpop.eup %1433 }
 0x39d   : > { %v450_v7 = vmul.f32 %v1434_v5, %v1426_v51  ;;  %v565_v10 = vpop.permute.xlu1 %564 }
 0x39e   : > { %v570_v14 = vsel %vm457_vm3, %v565_v10, 0 }
 0x39f   : > { %v451_v12 = vpack.c.bf16 %v450_v7, %v450_v7  ;;  %v1419_v7 = vld [vmem:[#allocation2] sm:$0xff]  }
 0x3a1   : > { %v670_v6 = vpop.xlane.xlu0 %669 }
 0x3a2   : > { %1437 = vrcp.f32 %v670_v6 }
 0x3a4   : > { %v1436_v13 = vpop.eup %1435 }
 0x3a5   : > { %v453_v8 = vpop.permute.xlu0 %452  ;;  %v562_v11 = vmul.f32 %v1436_v13, %v1428_v56  ;;  %v857_v56 = vrot.slane %v1794_v55, %v856_v54 }
 0x3a6   : > { %v459_v9 = vsel %vm457_vm3, %v453_v8, 0  ;;  %v1420_v8 = vld [vmem:[#allocation2 + $0x8] sm:$0xff]  }
 0x3a7   : > { %1278 = vmatpush3.bf16.msra.mxu0 %v459_v9  ;;  %v563_v15 = vpack.c.bf16 %v562_v11, %v562_v11  ;;  %v1422_v9 = vld [vmem:[%s1884_s4 + $0x8] sm:$0xff]   ;;  %v935_v11 = vsub.s32 2, %v1788_v53 }
 0x3a8   : > { %1289 = vmatprep.subr.bf16.mxu0 %v1544_v0 }
 0x3a9   : > { %v785_v21 = vpop.permute.xlu0 %784 }
 0x3aa   : > { %1280 = vmatmul.mubr.msk.bf16.vlgmr.msra.gmra.mrb[4].mxu0 %vm393_vm2, %v451_v12  ;;  %v790_v23 = vsel %vm457_vm3, %v785_v21, 0 }
 0x3ab   : > { %1290 = vmatpush3.bf16.msra.mxu0 %v570_v14  ;;  %1291 = vmatprep.mubr.msk.bf16.mxu0 %vm1545_vm0, %v1544_v0  ;;  %v930_v14 = vsub.s32 1, %v1788_v53 }
 0x3ac   : > { %1301 = vmatprep.subr.bf16.mxu0 %v1544_v0  ;;  %v1438_v16 = vpop.eup %1437 }
 0x3ad   : > { %v672_v18 = vmul.f32 %v1438_v16, %v1430_v58 }
 0x3af   : > { %v673_v22 = vpack.c.bf16 %v672_v18, %v672_v18  ;;  %v936_v18 = vrot.slane %v1794_v55, %v935_v11 }
 0x3b2   : > { %1292 = vmatmul.mubr.msk.bf16.vlgmr.msra.gmra.mrb[8].mxu0 %vm393_vm2, %v563_v15  ;;  %v931_v15 = vrot.slane %v1794_v55, %v930_v14 }
 0x3b3   : > { %1303 = vmatprep.mubr.msk.bf16.mxu0 %vm1545_vm0, %v1544_v0 }
 0x3ce   : > { %v780_v17 = vpop.xlane.xlu1 %779 }
 0x3cf   : > { %1439 = vrcp.f32 %v780_v17 }
 0x3d2   : > { %v675_v19 = vpop.permute.xlu1 %674 }
 0x3d3   : > { %v680_v20 = vsel %vm457_vm3, %v675_v19, 0 }
 0x3d4   : > { %1302 = vmatpush3.bf16.msra.mxu0 %v680_v20 }
 0x3d5   : > { %1313 = vmatprep.subr.bf16.mxu0 %v1544_v0 }
 0x3d7   : > { %1304 = vmatmul.mubr.msk.bf16.vlgmr.msra.gmra.mrb[12].mxu0 %vm393_vm2, %v673_v22  ;;  %v1423_v22 = vld [vmem:[%s1884_s4 + $0x10] sm:$0xff]  }
 0x3d8   : > { %1314 = vmatpush3.bf16.msra.mxu0 %v790_v23  ;;  %1315 = vmatprep.mubr.msk.bf16.mxu0 %vm1545_vm0, %v1544_v0  ;;  %v1424_v23 = vld [vmem:[%s1884_s4 + $0x18] sm:$0xff]  }
 0x3d9   : > { %v1440_v24 = vpop.eup %1439  ;;  %1327 = vmatprep.subr.bf16.mxu0 %v1544_v0 }
 0x3da   : > { %v782_v25 = vmul.f32 %v1440_v24, %v1432_v63  ;;  %v1220_v24 = vld [vmem:[%s1886_s6] ss:$0 sm:$0xff] }
 0x3dc   : > { %v783_v26 = vpack.c.bf16 %v782_v25, %v782_v25 }
 0x3df   : > { %1316 = vmatmul.mubr.msk.bf16.vlgmr.msra.gmra.mrb[16].mxu0 %vm393_vm2, %v783_v26 }
 0x3e0   : > { %1331 = vmatprep.mubr.msk.bf16.mxu0 %vm1545_vm0, %v1544_v0  ;;  %1328 = vmatpush3.bf16.msra.mxu0 %v1419_v7 }
 0x3e1   : > { %1329 = vmatprep.subr.bf16.mxu0 %v1544_v0 }
 0x3e4   : > { %1330 = vmatpush3.bf16.msra.mxu0 %v1420_v8 }
 0x47d   : > { %v495_v27 = vpop.f32.mrb[4].mxu0 }
 0x47e   : > { %v1281_v28 = vpop.f32.mrb[5].mxu0 }
 0x47f   : > { %v498_v29 = vpop.f32.mrb[6].mxu0 }
 0x480   : > { %v1282_v30 = vpop.f32.mrb[7].mxu0 }
 0x485   : > { %v606_v31 = vpop.f32.mrb[8].mxu0 }
 0x486   : > { %833 = vrot.lane.b32.xlu1 %v606_v31, %s1557_s13  ;;  %v1293_v32 = vpop.f32.mrb[9].mxu0  ;;  %s1837_s13 = scalar_lea.hbm %s1888_s8, %s1230_s24 }
 0x487   : > { %v609_v33 = vpop.f32.mrb[10].mxu0 }
 0x488   : > { %v1294_v34 = vpop.f32.mrb[11].mxu0 }
 0x4aa   : > { %v716_v37 = vpop.f32.mrb[12].mxu0 }
 0x4ab   : > { %837 = vrot.lane.b32.xlu0 %v716_v37, %s1558_s17  ;;  %v1305_v38 = vpop.f32.mrb[13].mxu0 }
 0x4ac   : > { %v719_v39 = vpop.f32.mrb[14].mxu0 }
 0x4ad   : > { %v1306_v40 = vpop.f32.mrb[15].mxu0 }
 0x4b2   : > { %v826_v41 = vpop.f32.mrb[16].mxu0 }
 0x4b3   : > { %841 = vrot.lane.b32.xlu1 %v826_v41, %s1559_s20  ;;  %v1317_v42 = vpop.f32.mrb[17].mxu0  ;;  %s309_s20 = sand.u32 1, %s1531_s28  }
 0x4b4   : > { %v829_v43 = vpop.f32.mrb[18].mxu0  ;;  %s1203_s23 = sshll.u32 %s309_s20, 3  ;;  %s1113_s18 = scalar_lea.sflag [#allocation4], %s309_s20 }
 0x4b5   : > { %v1318_v44 = vpop.f32.mrb[19].mxu0  ;;  %s311_s25 = scalar_lea.vmem [#allocation5], %s1203_s23 }
 0x4b6   : > { %s1126_s26 = sshll.u32 %s311_s25, 4  ;;  %s1839_s26 = int_to_ptr.vmem [resolvable:$true] %s1126_s26 }
 0x4b7   : > { %s1473_s21 = scalar_lea.vmem %s1839_s26, 128  ;;  %p1480_p2 = scmp.lt.s32.totalorder %s1839_s26, %s1478_s22 }
 0x4b8   : > { %p1474_p6 = scmp.ne.s32.totalorder %s1839_s26, %s1473_s21  ;;  %p1481_p3 = scmp.lt.s32.totalorder %s1479_s19, %s1473_s21 }
 0x4ba   : > { %p1475_p10 = pnand %p1474_p6, %p1899_p9  ;;  %p1482_p4 = por %p1481_p3, %p1480_p2 }
 0x4bc   : > { %p1476_p12 = pneg %p1475_p10 }
 0x4be   : > { %p1483_p7 = pnand %p1482_p4, %p1476_p12 }
 0x4f8   : > { %v834_v45 = vpop.permute.xlu1 %833 }
 0x4f9   : > { %v844_v47 = vsel %vm393_vm2, %v495_v27, %v834_v45 }
 0x51d   : > { %v838_v46 = vpop.permute.xlu0 %837 }
 0x51e   : > { %v846_v48 = vsel %vm845_vm4, %v844_v47, %v838_v46 }
 0x525   : > { %v842_v49 = vpop.permute.xlu1 %841 }
 0x526   : > { %v848_v50 = vsel %vm847_vm5, %v846_v48, %v842_v49  ;;  %v1103_v48 = vsub.s32 4, %v1788_v53  ;;  %v1108_v49 = vsub.s32 5, %v1788_v53 }
 0x527   : > { %v849_v51 = vpack.c.bf16 %v848_v50, %v848_v50 }
 0x528   : > { %v1104_v50 = vrot.slane %v1794_v55, %v1103_v48  ;;  %v1109_v54 = vrot.slane %v1794_v55, %v1108_v49 }
 0x529   : > { %1324 = vmatmul.mubr.msk.bf16.vlgmr.msra.gmra.mrb[16].mxu1 %vm343_vm1, %v849_v51 }
 0x52a   : > { %1343 = vmatprep.mubr.msk.bf16.mxu1 %vm1545_vm0, %v1544_v0 }
 0x5fc   : > { %v907_v57 = vpop.f32.mrb[16].mxu1 }
 0x5fd   : > { %v908_v58 = vadd.f32 %v907_v57, %v857_v56  ;;  %v1325_v59 = vpop.f32.mrb[17].mxu1 }
 0x5fe   : > { %v910_v60 = vpop.f32.mrb[18].mxu1 }
 0x5ff   : > { %v1326_v61 = vpop.f32.mrb[19].mxu1  ;;  %v913_v62 = vadd.f32 %v908_v58, %v1706_v3  ;;  %v1421_v3 = vld [vmem:[%s1884_s4] sm:$0xff]  }
 0x600   : > { %1336 = vmatpush3.bf16.msra.mxu1 %v1421_v3 }
 0x601   : > { %v914_v63 = vsel %vm343_vm1, %v913_v62, 0.0  ;;  %1337 = vmatprep.subr.bf16.mxu1 %v1544_v0 }
 0x602   : > { %915 = vadd.xlane.f32.xlu0 %v914_v63 }
 0x604   : > { %1338 = vmatpush3.bf16.msra.mxu1 %v1422_v9 }
 0x605   : > { %1339 = vmatprep.subr.bf16.mxu1 %v1544_v0 }
 0x608   : > { %1340 = vmatpush3.bf16.msra.mxu1 %v1423_v22 }
 0x609   : > { %1341 = vmatprep.subr.bf16.mxu1 %v1544_v0  ;;  %v1017_v0 = vsub.s32 3, %v1788_v53 }
 0x60b   : > { %v1018_v32 = vrot.slane %v1794_v55, %v1017_v0 }
 0x60c   : > { %1342 = vmatpush3.bf16.msra.mxu1 %v1424_v23 }
 0x68f   : > { %v916_v1 = vpop.xlane.xlu0 %915 }
 0x690   : > { %v918_v2 = vmul.f32 0.03125, %v916_v1 }
 0x692   : > { %v919_v4 = vsub.f32 %v913_v62, %v918_v2 }
 0x694   : > { %v920_v5 = vmul.f32 %v919_v4, %v919_v4 }
 0x696   : > { %v921_v6 = vsel %vm343_vm1, %v920_v5, 0.0 }
 0x697   : > { %922 = vadd.xlane.f32.xlu1 %v921_v6 }
 0x724   : > { %v923_v10 = vpop.xlane.xlu1 %922 }
 0x725   : > { %v924_v12 = vmul.f32 0.03125, %v923_v10 }
 0x727   : > { %v925_v13 = vadd.f32 1e-12, %v924_v12 }
 0x729   : > { %1441 = vrsqrt.f32 %v925_v13 }
 0x733   : > { %v1442_v16 = vpop.eup %1441 }
 0x734   : > { %v927_v17 = vmul.f32 %v1442_v16, %v919_v4 }
 0x736   : > { %v932_v19 = vmul.f32 %v931_v15, %v927_v17 }
 0x738   : > { %v937_v20 = vadd.f32 %v936_v18, %v932_v19 }
 0x73a   : > { %v938_v21 = vpack.c.bf16 %v937_v20, %v937_v20 }
 0x73c   : > { %1332 = vmatmul.mubr.msk.bf16.vlgmr.msra.gmra.mrb[20].mxu0 %vm343_vm1, %v938_v21 }
 0x80f   : > { %v999_v25 = vpop.f32.mrb[20].mxu0 }
 0x810   : > { %v1000_v26 = vadd.f32 %v1220_v24, %v999_v25  ;;  %v1333_v27 = vpop.f32.mrb[21].mxu0 }
 0x811   : > { %v1002_v28 = vpop.f32.mrb[22].mxu0 }
 0x812   : > { %v1005_v29 = vmax.f32 %v1000_v26, 0.0  ;;  %v1334_v30 = vpop.f32.mrb[23].mxu0 }
 0x814   : > { %v1006_v31 = vpack.c.bf16 %v1005_v29, %v1005_v29 }
 0x816   : > { %1344 = vmatmul.mubr.msk.bf16.vlgmr.msra.gmra.mrb[20].mxu1 %vm1043_vm6, %v1006_v31 }
 0x8e9   : > { %v1081_v33 = vpop.f32.mrb[20].mxu1 }
 0x8ea   : > { %v1082_v34 = vadd.f32 %v1081_v33, %v1018_v32  ;;  %v1345_v35 = vpop.f32.mrb[21].mxu1 }
 0x8eb   : > { %v1084_v36 = vpop.f32.mrb[22].mxu1 }
 0x8ec   : > { %v1346_v37 = vpop.f32.mrb[23].mxu1  ;;  %v1087_v38 = vadd.f32 %v1082_v34, %v937_v20 }
 0x8ee   : > { %v1088_v39 = vsel %vm343_vm1, %v1087_v38, 0.0 }
 0x8ef   : > { %1089 = vadd.xlane.f32.xlu0 %v1088_v39 }
 0x97c   : > { %v1090_v40 = vpop.xlane.xlu0 %1089 }
 0x97d   : > { %v1091_v41 = vmul.f32 0.03125, %v1090_v40 }
 0x97f   : > { %v1092_v42 = vsub.f32 %v1087_v38, %v1091_v41 }
 0x981   : > { %v1093_v43 = vmul.f32 %v1092_v42, %v1092_v42 }
 0x983   : > { %v1094_v44 = vsel %vm343_vm1, %v1093_v43, 0.0 }
 0x984   : > { %1095 = vadd.xlane.f32.xlu0 %v1094_v44 }
 0xa11   : > { %v1096_v45 = vpop.xlane.xlu0 %1095 }
 0xa12   : > { %v1097_v46 = vmul.f32 0.03125, %v1096_v45 }
 0xa14   : > { %v1098_v47 = vadd.f32 1e-12, %v1097_v46 }
 0xa16   : > { %1443 = vrsqrt.f32 %v1098_v47 }
 0xa20   : > { %v1444_v51 = vpop.eup %1443 }
 0xa21   : > { %v1100_v52 = vmul.f32 %v1444_v51, %v1092_v42 }
 0xa23   : > { %v1105_v56 = vmul.f32 %v1104_v50, %v1100_v52 }
 0xa25   : > { %v1110_v57 = vadd.f32 %v1109_v54, %v1105_v56 }
 0xa27   : > { %1111 = vst.msk [vmem:[%s311_s25] sm:$0xff] %vm343_vm1, %v1110_v57 }
 0xa28   : > { %1486 = shalt.err (!%p1483_p7)
}
 0xa29   : > { %s1487_s17 = scalar_lea.hbm %s1837_s13, 128  ;;  %s1491_s24 = scalar_lea.hbm %s1888_s8, 256 }
 0xa2a   : > { %p1488_p8 = scmp.ne.s32.totalorder %s1837_s13, %s1487_s17  ;;  %p1492_p1 = scmp.lt.u32.totalorder %s1837_s13, %s1888_s8 }
 0xa2b   : > { %p1493_p0 = scmp.lt.u32.totalorder %s1491_s24, %s1487_s17  ;;  %p1495_p6 = scmp.lt.u32.totalorder %s1487_s17, %s1837_s13 }
 0xa2c   : > { %p1489_p11 = pnand %p1488_p8, %p1899_p9 }
 0xa2d   : > { %p1494_p5 = por %p1493_p0, %p1492_p1 }
 0xa2e   : > { %p1490_p13 = pneg %p1489_p11 }
 0xa2f   : > { %p1496_p10 = por %p1495_p6, %p1494_p5 }
 0xa31   : > { %p1497_p12 = pnand %p1496_p10, %p1490_p13 }
 0xa33   : > { %1500 = shalt.err (!%p1497_p12)
}
 0xa34   : > { %1351 = dma.vmem_to_hbm [thread:$0]  (%p1899_p9), %s1839_s26, 128, %s1837_s13, %s1113_s18  }
 0xa35 PF: > { %p1363_p2 = scmp.ge.s32.totalorder %s1539_s30, 2  ;;  %s1138_s12 = sand.u32 1, %s1527_s27  }
 0xa36   : > { %p1900_p3 = scmp.ne.s32.totalorder %s1893_s16, 0  ;;  %s1139_s21 = scalar_lea.sflag [#allocation4], %s1138_s12 }
 0xa38   : > { %p1358_p4 = pnand %p1363_p2, %p1900_p3 }
 0xa3a   : > { %1522 = dma.done.wait (!%p1358_p4), %s1139_s21, 128  }
 0xa3b   : > { %1524 = vsyncadd (!%p1358_p4), %s1139_s21, 4294967168  ;;  %p19_p7 = scmp.ge.s32.totalorder %s1631_s11, 4   ;;  %s1901_s27 = smov %s1531_s28 }
 0xa3c   : > { %s1902_s28 = smov %s1535_s29  ;;  %s1903_s29 = smov %s1642_s14 }
 0xa3d   : > { %s1904_s30 = smov %s1631_s11  ;;  %21 = sbr.rel (!%p19_p7) target bundleno = 4 (0x4), region = 92 }
 0xa44   :  { %1144 = vsyncpa [#allocation3], 1 }
 0xa45   :  { %1146 = vsyncpa [#allocation3 + $0x1], 1 }
 0xa46   :  { %1147 = vsyncpa [#allocation4], 1 }
 0xa47   :  { %1149 = vsyncpa [#allocation4 + $0x1], 1 }

</bundles_post_ra>
